<compile_context>
chip_gen: v7x
topology: tpu7x:2x2x1
jax: 0.10.0
libtpu: 0.0.40
codegen_flags: <defaults>
</compile_context>

<pallas_src>
import jax
import jax.numpy as jnp
from jax.experimental import pallas as pl
from jax.experimental.pallas import tpu as pltpu

IN_DIM = 24 * 2      # 48
H1 = 128
H2 = 64
OUT_DIM = 24 * 2     # 48


def _mlp_kernel(x_ref, w1_ref, b1_ref, w2_ref, b2_ref, w3_ref, b3_ref, o_ref):
    # Fused 3-layer MLP on one batch tile.  Matmuls on the MXU (bf16 inputs,
    # f32 accumulation), bias-add + ReLU on the VPU in f32.
    x = x_ref[...].astype(jnp.bfloat16)                         # (TB, 48)
    h1 = jnp.dot(x, w1_ref[...],
                 preferred_element_type=jnp.float32) + b1_ref[...]
    h1 = jnp.maximum(h1, 0.0)                                   # (TB, 128) f32
    h2 = jnp.dot(h1.astype(jnp.bfloat16), w2_ref[...],
                 preferred_element_type=jnp.float32) + b2_ref[...]
    h2 = jnp.maximum(h2, 0.0)                                   # (TB, 64) f32
    out = jnp.dot(h2.astype(jnp.bfloat16), w3_ref[...],
                  preferred_element_type=jnp.float32) + b3_ref[...]
    o_ref[...] = out.astype(o_ref.dtype)                        # (TB, 48) f32


def prepare_params(params):
    """Cast weights to bf16 (MXU-native); biases stay f32 (f32 bias-add)."""
    w1, b1, w2, b2, w3, b3 = params
    return (w1.astype(jnp.bfloat16), b1.astype(jnp.float32),
            w2.astype(jnp.bfloat16), b2.astype(jnp.float32),
            w3.astype(jnp.bfloat16), b3.astype(jnp.float32))


def backgammon_nn_forward(x, params, *, block_batch=4096):
    """x: (B, 48) float32.  Returns (B, 24, 2) float32."""
    w1, b1, w2, b2, w3, b3 = prepare_params(params)
    B = x.shape[0]

    # Tile choice: large batches use 4096-row tiles (per-tile DMA time well
    # above the ~0.35 us per-grid-step overhead on all generations; ~4 MB of
    # double-buffered VMEM per streamed array -- comfortably inside the limit
    # even on v7x).  Smaller batches use one full-batch tile (block shape ==
    # array shape, so the (8,128) divisibility rule is satisfied for any B).
    if B > block_batch:
        TB = block_batch
    else:
        TB = max(B, 1)
    grid = (pl.cdiv(B, TB),)

    flops = 2 * B * (IN_DIM * H1 + H1 * H2 + H2 * OUT_DIM)
    bytes_accessed = (B * IN_DIM * 4                      # x in (f32)
                      + B * OUT_DIM * 4                   # out (f32)
                      + (w1.size + w2.size + w3.size) * 2
                      + (b1.size + b2.size + b3.size) * 4)

    # Weights/biases: same block every grid step -> stay VMEM-resident.
    resident = lambda arr: pl.BlockSpec(arr.shape, lambda i: (0,) * arr.ndim)

    out = pl.pallas_call(
        _mlp_kernel,
        out_shape=jax.ShapeDtypeStruct((B, OUT_DIM), jnp.float32),
        grid=grid,
        in_specs=[
            pl.BlockSpec((TB, IN_DIM), lambda i: (i, 0)),   # stream x tiles
            resident(w1), resident(b1),
            resident(w2), resident(b2),
            resident(w3), resident(b3),
        ],
        out_specs=pl.BlockSpec((TB, OUT_DIM), lambda i: (i, 0)),
        compiler_params=pltpu.CompilerParams(
            dimension_semantics=("parallel",)),             # megacore on v7x
        cost_estimate=pl.CostEstimate(
            flops=flops, bytes_accessed=bytes_accessed, transcendentals=0),
    )(x, w1, b1, w2, b2, w3, b3)

    # .view(-1, 24, 2): pure metadata (no copy) since out is exactly (B, 48).
    return out.reshape(-1, 24, 2)


def init_params(key):
    """Deterministic init mirroring nn.Linear default (uniform +-1/sqrt(fan_in)).

    Weights stored as (in_features, out_features); biases as (1, out)."""
    def linear(key, fan_in, fan_out):
        kw, kb = jax.random.split(key)
        bound = 1.0 / jnp.sqrt(fan_in)
        w = jax.random.uniform(kw, (fan_in, fan_out), jnp.float32, -bound, bound)
        b = jax.random.uniform(kb, (1, fan_out), jnp.float32, -bound, bound)
        return w, b

    k1, k2, k3 = jax.random.split(key, 3)
    w1, b1 = linear(k1, IN_DIM, H1)
    w2, b2 = linear(k2, H1, H2)
    w3, b3 = linear(k3, H2, OUT_DIM)
    return (w1, b1, w2, b2, w3, b3)


def reference_forward(x, params):
    """Pure-JAX reference mirroring the kernel's bf16-input / f32-accumulate math."""
    w1, b1, w2, b2, w3, b3 = params
    xb = x.astype(jnp.bfloat16)
    h1 = jnp.maximum(jnp.dot(xb, w1.astype(jnp.bfloat16),
                             preferred_element_type=jnp.float32) + b1, 0.0)
    h2 = jnp.maximum(jnp.dot(h1.astype(jnp.bfloat16), w2.astype(jnp.bfloat16),
                             preferred_element_type=jnp.float32) + b2, 0.0)
    out = jnp.dot(h2.astype(jnp.bfloat16), w3.astype(jnp.bfloat16),
                  preferred_element_type=jnp.float32) + b3
    return out.reshape(-1, 24, 2)


if __name__ == "__main__":
    key = jax.random.PRNGKey(0)
    k_params, k_x1, k_x2 = jax.random.split(key, 3)

    params = init_params(k_params)

    # Small demo batch.
    batch = 8
    x = jax.random.normal(k_x1, (batch, IN_DIM), jnp.float32)
    out = jax.block_until_ready(backgammon_nn_forward(x, params))
    ref = reference_forward(x, params)
    assert out.shape == (batch, 24, 2), out.shape
    assert jnp.allclose(out, ref, atol=1e-3, rtol=1e-3), "mismatch vs reference (batch=8)"

    # Batch that is not a multiple of 8 -> exercises the full-batch-tile path.
    batch2 = 137
    x2 = jax.random.normal(k_x2, (batch2, IN_DIM), jnp.float32)
    out2 = jax.block_until_ready(backgammon_nn_forward(x2, params))
    ref2 = reference_forward(x2, params)
    assert out2.shape == (batch2, 24, 2), out2.shape
    assert jnp.allclose(out2, ref2, atol=1e-3, rtol=1e-3), "mismatch vs reference (batch=137)"

    print("KERNEL_OK")
</pallas_src>

<mosaic_0001>
module attributes {stable_mosaic.version = 11 : i64} {
  func.func @_mlp_kernel(%arg0: i32, %arg1: memref<8x48xf32, #tpu.memory_space<vmem>>, %arg2: memref<48x128xbf16, #tpu.memory_space<vmem>>, %arg3: memref<1x128xf32, #tpu.memory_space<vmem>>, %arg4: memref<128x64xbf16, #tpu.memory_space<vmem>>, %arg5: memref<1x64xf32, #tpu.memory_space<vmem>>, %arg6: memref<64x48xbf16, #tpu.memory_space<vmem>>, %arg7: memref<1x48xf32, #tpu.memory_space<vmem>>, %arg8: memref<8x48xf32, #tpu.memory_space<vmem>>) attributes {dimension_semantics = [#tpu.dimension_semantics<parallel>], iteration_bounds = array<i64: 1>, scalar_prefetch = 0 : i64, scratch_operands = 0 : i64, tpu.core_type = #tpu.core_type<tc>, window_params = [{transform_indices = @transform_0, window_bounds = array<i64: 8, 48>}, {pipeline_mode = #tpu.pipeline_mode<synchronous>, transform_indices = @transform_1, window_bounds = array<i64: 48, 128>}, {pipeline_mode = #tpu.pipeline_mode<synchronous>, transform_indices = @transform_2, window_bounds = array<i64: 1, 128>}, {pipeline_mode = #tpu.pipeline_mode<synchronous>, transform_indices = @transform_3, window_bounds = array<i64: 128, 64>}, {pipeline_mode = #tpu.pipeline_mode<synchronous>, transform_indices = @transform_4, window_bounds = array<i64: 1, 64>}, {pipeline_mode = #tpu.pipeline_mode<synchronous>, transform_indices = @transform_5, window_bounds = array<i64: 64, 48>}, {pipeline_mode = #tpu.pipeline_mode<synchronous>, transform_indices = @transform_6, window_bounds = array<i64: 1, 48>}, {transform_indices = @transform_7, window_bounds = array<i64: 8, 48>}]} {
    %c0 = arith.constant 0 : index
    %c0_0 = arith.constant 0 : index
    %0 = vector.load %arg1[%c0, %c0_0] : memref<8x48xf32, #tpu.memory_space<vmem>>, vector<8x48xf32>
    %1 = arith.truncf %0 : vector<8x48xf32> to vector<8x48xbf16>
    %c0_1 = arith.constant 0 : index
    %c0_2 = arith.constant 0 : index
    %2 = vector.load %arg2[%c0_1, %c0_2] : memref<48x128xbf16, #tpu.memory_space<vmem>>, vector<48x128xbf16>
    %cst = arith.constant dense<0.000000e+00> : vector<8x128xf32>
    %3 = tpu.matmul %1, %2, %cst {dimension_numbers = #tpu.dot_dimension_numbers<[1], [0], [0], [1], [0, 0, 1, 1], [], []>} : vector<8x48xbf16>, vector<48x128xbf16>, vector<8x128xf32> -> vector<8x128xf32>
    %c0_3 = arith.constant 0 : index
    %c0_4 = arith.constant 0 : index
    %4 = vector.load %arg3[%c0_3, %c0_4] : memref<1x128xf32, #tpu.memory_space<vmem>>, vector<1x128xf32>
    %5 = vector.broadcast %4 : vector<1x128xf32> to vector<8x128xf32>
    %6 = arith.addf %3, %5 : vector<8x128xf32>
    %cst_5 = arith.constant 0.000000e+00 : f32
    %7 = vector.broadcast %cst_5 : f32 to vector<8x128xf32>
    %8 = arith.maximumf %6, %7 : vector<8x128xf32>
    %9 = arith.truncf %8 : vector<8x128xf32> to vector<8x128xbf16>
    %c0_6 = arith.constant 0 : index
    %c0_7 = arith.constant 0 : index
    %10 = vector.load %arg4[%c0_6, %c0_7] : memref<128x64xbf16, #tpu.memory_space<vmem>>, vector<128x64xbf16>
    %cst_8 = arith.constant dense<0.000000e+00> : vector<8x64xf32>
    %11 = tpu.matmul %9, %10, %cst_8 {dimension_numbers = #tpu.dot_dimension_numbers<[1], [0], [0], [1], [0, 0, 1, 1], [], []>} : vector<8x128xbf16>, vector<128x64xbf16>, vector<8x64xf32> -> vector<8x64xf32>
    %c0_9 = arith.constant 0 : index
    %c0_10 = arith.constant 0 : index
    %12 = vector.load %arg5[%c0_9, %c0_10] : memref<1x64xf32, #tpu.memory_space<vmem>>, vector<1x64xf32>
    %13 = vector.broadcast %12 : vector<1x64xf32> to vector<8x64xf32>
    %14 = arith.addf %11, %13 : vector<8x64xf32>
    %cst_11 = arith.constant 0.000000e+00 : f32
    %15 = vector.broadcast %cst_11 : f32 to vector<8x64xf32>
    %16 = arith.maximumf %14, %15 : vector<8x64xf32>
    %17 = arith.truncf %16 : vector<8x64xf32> to vector<8x64xbf16>
    %c0_12 = arith.constant 0 : index
    %c0_13 = arith.constant 0 : index
    %18 = vector.load %arg6[%c0_12, %c0_13] : memref<64x48xbf16, #tpu.memory_space<vmem>>, vector<64x48xbf16>
    %cst_14 = arith.constant dense<0.000000e+00> : vector<8x48xf32>
    %19 = tpu.matmul %17, %18, %cst_14 {dimension_numbers = #tpu.dot_dimension_numbers<[1], [0], [0], [1], [0, 0, 1, 1], [], []>} : vector<8x64xbf16>, vector<64x48xbf16>, vector<8x48xf32> -> vector<8x48xf32>
    %c0_15 = arith.constant 0 : index
    %c0_16 = arith.constant 0 : index
    %20 = vector.load %arg7[%c0_15, %c0_16] : memref<1x48xf32, #tpu.memory_space<vmem>>, vector<1x48xf32>
    %21 = vector.broadcast %20 : vector<1x48xf32> to vector<8x48xf32>
    %22 = arith.addf %19, %21 : vector<8x48xf32>
    %c0_17 = arith.constant 0 : index
    %c0_18 = arith.constant 0 : index
    %23 = vector.load %arg8[%c0_17, %c0_18] : memref<8x48xf32, #tpu.memory_space<vmem>>, vector<8x48xf32>
    tpu.vector_store %arg8[%c0_17, %c0_18], %22 {strides = array<i32>} : memref<8x48xf32, #tpu.memory_space<vmem>>, vector<8x48xf32>,
    return
  }
  func.func @transform_0(%arg0: i32) -> (i32, i32) {
    %c0_i32 = arith.constant 0 : i32
    %c0_i32_0 = arith.constant 0 : i32
    return %arg0, %c0_i32 : i32, i32
  }
  func.func @transform_1(%arg0: i32) -> (i32, i32) {
    %c0_i32 = arith.constant 0 : i32
    %c0_i32_0 = arith.constant 0 : i32
    %c0_i32_1 = arith.constant 0 : i32
    return %c0_i32, %c0_i32_0 : i32, i32
  }
  func.func @transform_2(%arg0: i32) -> (i32, i32) {
    %c0_i32 = arith.constant 0 : i32
    %c0_i32_0 = arith.constant 0 : i32
    %c0_i32_1 = arith.constant 0 : i32
    return %c0_i32, %c0_i32_0 : i32, i32
  }
  func.func @transform_3(%arg0: i32) -> (i32, i32) {
    %c0_i32 = arith.constant 0 : i32
    %c0_i32_0 = arith.constant 0 : i32
    %c0_i32_1 = arith.constant 0 : i32
    return %c0_i32, %c0_i32_0 : i32, i32
  }
  func.func @transform_4(%arg0: i32) -> (i32, i32) {
    %c0_i32 = arith.constant 0 : i32
    %c0_i32_0 = arith.constant 0 : i32
    %c0_i32_1 = arith.constant 0 : i32
    return %c0_i32, %c0_i32_0 : i32, i32
  }
  func.func @transform_5(%arg0: i32) -> (i32, i32) {
    %c0_i32 = arith.constant 0 : i32
    %c0_i32_0 = arith.constant 0 : i32
    %c0_i32_1 = arith.constant 0 : i32
    return %c0_i32, %c0_i32_0 : i32, i32
  }
  func.func @transform_6(%arg0: i32) -> (i32, i32) {
    %c0_i32 = arith.constant 0 : i32
    %c0_i32_0 = arith.constant 0 : i32
    %c0_i32_1 = arith.constant 0 : i32
    return %c0_i32, %c0_i32_0 : i32, i32
  }
  func.func @transform_7(%arg0: i32) -> (i32, i32) {
    %c0_i32 = arith.constant 0 : i32
    %c0_i32_0 = arith.constant 0 : i32
    return %arg0, %c0_i32 : i32, i32
  }
}

</mosaic_0001>

<bundles_post_ra>
// kernel: tpu_custom_call.1
= control target key start
LH: loop header
LB: loop body
LE: loop exit
PB: predicated region body
PF: predicated region fallthrough
CT: control target
= control target key end

     0   :  { %v440_v1 = vmov 0.0   ;;  %vm441_vm0 = vmmov 0   ;;  %vm61_vm1 = vcmask 392192   ;;  %s557_s0 = inlined_call_operand.vmem [shape: f32[8,48], index: 0, kind: input, shape index: {}]   ;;  %s558_s1 = inlined_call_operand.vmem [shape: bf16[48,128], index: 1, kind: input, shape index: {}]   ;;  %s559_s2 = inlined_call_operand.vmem [shape: f32[1,128], index: 2, kind: input, shape index: {}]   ;;  %s560_s3 = inlined_call_operand.vmem [shape: bf16[128,64], index: 3, kind: input, shape index: {}]   ;;  %s561_s4 = inlined_call_operand.vmem [shape: f32[1,64], index: 4, kind: input, shape index: {}]   ;;  %s562_s5 = inlined_call_operand.vmem [shape: bf16[64,48], index: 5, kind: input, shape index: {}]   ;;  %s563_s6 = inlined_call_operand.vmem [shape: f32[1,48], index: 6, kind: input, shape index: {}]   ;;  %s564_s7 = inlined_call_operand.hbm [shape: f32[8,48], index: 7, kind: output, shape index: {}]  }
   0x1   :  { %v401_v0 = vld [vmem:[%s558_s1] sm:$0xff]   ;;  %356 = vmatprep.subr.bf16.mxu0 %v440_v1  ;;  %366 = vmatprep.subr.bf16.mxu1 %v440_v1  ;;  %v402_v2 = vld [vmem:[%s558_s1 + $0x8] sm:$0xff]   ;;  %v403_v3 = vld [vmem:[%s558_s1 + $0x10] sm:$0xff]  }
   0x2   :  { %357 = vmatpush3.bf16.msra.mxu0 %v401_v0  ;;  %362 = vmatprep.mubr.msk.bf16.mxu0 %vm441_vm0, %v440_v1  ;;  %v404_v4 = vld [vmem:[%s560_s3] sm:$0xff]   ;;  %v405_v6 = vld [vmem:[%s560_s3 + $0x8] sm:$0xff]   ;;  %v406_v8 = vld [vmem:[%s560_s3 + $0x10] sm:$0xff]  }
   0x3   :  { %358 = vmatprep.subr.bf16.mxu0 %v440_v1  ;;  %382 = vmatprep.mubr.msk.bf16.mxu1 %vm441_vm0, %v440_v1  ;;  %v28_v5 = vld [vmem:[%s557_s0] sm:$0xff] }
   0x4   :  { %367 = vmatpush3.bf16.msra.mxu1 %v404_v4  ;;  %v29_v7 = vpack.c.bf16 %v28_v5, %v28_v5 }
   0x5   :  { %368 = vmatprep.subr.bf16.mxu1 %v440_v1 }
   0x6   :  { %359 = vmatpush3.bf16.msra.mxu0 %v402_v2 }
   0x7   :  { %360 = vmatprep.subr.bf16.mxu0 %v440_v1 }
   0x8   :  { %369 = vmatpush3.bf16.msra.mxu1 %v405_v6 }
   0x9   :  { %370 = vmatprep.subr.bf16.mxu1 %v440_v1 }
   0xa   :  { %361 = vmatpush3.bf16.msra.mxu0 %v403_v3 }
   0xb   :  { %386 = vmatprep.subr.bf16.mxu0 %v440_v1 }
   0xd   :  { %363 = vmatmul.mubr.msk.bf16.vlgmr.msra.gmra.mrb[0].mxu0 %vm61_vm1, %v29_v7 }
   0xe   :  { %12 = vsyncpa [#allocation3], 0  ;;  %371 = vmatpush3.bf16.msra.mxu1 %v406_v8  ;;  %v407_v9 = vld [vmem:[%s560_s3 + $0x18] sm:$0xff]   ;;  %394 = vmatprep.mubr.msk.bf16.mxu0 %vm441_vm0, %v440_v1  ;;  %v408_v10 = vld [vmem:[%s560_s3 + $0x20] sm:$0xff]   ;;  %vm259_vm2 = vcmask 523264   ;;  %s442_s12 = smov [#allocation2]  }
   0xf   :  { %372 = vmatprep.subr.bf16.mxu1 %v440_v1  ;;  %v409_v11 = vld [vmem:[%s560_s3 + $0x28] sm:$0xff]   ;;  %v410_v12 = vld [vmem:[%s560_s3 + $0x30] sm:$0xff]   ;;  %v411_v13 = vld [vmem:[%s560_s3 + $0x38] sm:$0xff]  }
  0x10   :  { %v412_v14 = vld [vmem:[%s562_s5] sm:$0xff]   ;;  %v413_v15 = vld [vmem:[%s562_s5 + $0x8] sm:$0xff]   ;;  %v414_v24 = vld [vmem:[%s562_s5 + $0x10] sm:$0xff]  }
  0x11   :  { %387 = vmatpush3.bf16.msra.mxu0 %v412_v14  ;;  %v318_v16 = vld [vmem:[%s559_s2] ss:$0 sm:$0xff]  ;;  %v415_v25 = vld [vmem:[%s562_s5 + $0x18] sm:$0xff]   ;;  %s310_s5 = sshll.u32 %s442_s12, 4  ;;  %s311_s5 = int_to_ptr.vmem [resolvable:$true] %s310_s5 }
  0x12   :  { %373 = vmatpush3.bf16.msra.mxu1 %v407_v9  ;;  %388 = vmatprep.subr.bf16.mxu0 %v440_v1  ;;  %v323_v26 = vld [vmem:[%s561_s4] ss:$0 sm:$0xff]  ;;  %s416_s4 = scalar_lea.vmem %s311_s5, 128  ;;  %p421_p1 = scmp.lt.s32.totalorder %s311_s5, %s311_s5 }
  0x13   :  { %374 = vmatprep.subr.bf16.mxu1 %v440_v1  ;;  %v332_v34 = vld [vmem:[%s563_s6] ss:$0 sm:$0xff]  ;;  %p417_p0 = scmp.ne.s32.totalorder %s311_s5, %s416_s4  ;;  %p422_p2 = scmp.lt.s32.totalorder %s416_s4, %s416_s4 }
  0x15   :  { %389 = vmatpush3.bf16.msra.mxu0 %v413_v15  ;;  %p423_p3 = por %p422_p2, %p421_p1 }
  0x16   :  { %375 = vmatpush3.bf16.msra.mxu1 %v408_v10  ;;  %390 = vmatprep.subr.bf16.mxu0 %v440_v1 }
  0x17   :  { %376 = vmatprep.subr.bf16.mxu1 %v440_v1  ;;  %p424_p4 = pnand %p423_p3, %p417_p0 }
  0x19   :  { %391 = vmatpush3.bf16.msra.mxu0 %v414_v24 }
  0x1a   :  { %377 = vmatpush3.bf16.msra.mxu1 %v409_v11  ;;  %392 = vmatprep.subr.bf16.mxu0 %v440_v1 }
  0x1b   :  { %378 = vmatprep.subr.bf16.mxu1 %v440_v1 }
  0x1d   :  { %393 = vmatpush3.bf16.msra.mxu0 %v415_v25 }
  0x1e   :  { %379 = vmatpush3.bf16.msra.mxu1 %v410_v12 }
  0x1f   :  { %380 = vmatprep.subr.bf16.mxu1 %v440_v1 }
  0x22   :  { %381 = vmatpush3.bf16.msra.mxu1 %v411_v13 }
  0xe0   :  { %v99_v17 = vpop.f32.mrb[0].mxu0 }
  0xe1   :  { %v100_v18 = vadd.f32 %v318_v16, %v99_v17  ;;  %v364_v19 = vpop.f32.mrb[1].mxu0 }
  0xe2   :  { %v102_v20 = vpop.f32.mrb[2].mxu0 }
  0xe3   :  { %v105_v21 = vmax.f32 %v100_v18, 0.0  ;;  %v365_v22 = vpop.f32.mrb[3].mxu0 }
  0xe5   :  { %v106_v23 = vpack.c.bf16 %v105_v21, %v105_v21 }
  0xe7   :  { %383 = vmatmul.mubr.bf16.vlgmr.msra.gmra.mrb[0].mxu1 %v106_v23 }
 0x1ba   :  { %v212_v27 = vpop.f32.mrb[0].mxu1 }
 0x1bb   :  { %v213_v28 = vadd.f32 %v323_v26, %v212_v27  ;;  %v384_v29 = vpop.f32.mrb[1].mxu1 }
 0x1bc   :  { %v215_v30 = vpop.f32.mrb[2].mxu1 }
 0x1bd   :  { %v218_v31 = vmax.f32 %v213_v28, 0.0  ;;  %v385_v32 = vpop.f32.mrb[3].mxu1 }
 0x1bf   :  { %v219_v33 = vpack.c.bf16 %v218_v31, %v218_v31 }
 0x1c1   :  { %395 = vmatmul.mubr.msk.bf16.vlgmr.msra.gmra.mrb[4].mxu0 %vm259_vm2, %v219_v33 }
 0x294   :  { %v297_v35 = vpop.f32.mrb[4].mxu0 }
 0x295   :  { %v298_v36 = vadd.f32 %v332_v34, %v297_v35  ;;  %v396_v37 = vpop.f32.mrb[5].mxu0 }
 0x296   :  { %v300_v38 = vpop.f32.mrb[6].mxu0 }
 0x297   :  { %303 = vst.msk [vmem:[#allocation2] sm:$0xff] %vm61_vm1, %v298_v36  ;;  %v397_v39 = vpop.f32.mrb[7].mxu0 }
 0x298   :  { %427 = shalt.err (!%p424_p4)
}
 0x299   :  { %s428_s6 = scalar_lea.hbm %s564_s7, 128 }
 0x29a   :  { %p429_p5 = scmp.ne.s32.totalorder %s564_s7, %s428_s6  ;;  %p432_p6 = scmp.lt.u32.totalorder %s428_s6, %s564_s7 }
 0x29c   :  { %p434_p7 = pnand %p432_p6, %p429_p5 }
 0x29e   :  { %437 = shalt.err (!%p434_p7)
}
 0x29f   :  { %313 = dma.vmem_to_hbm [thread:$0]  %s311_s5, 128, %s564_s7, [#allocation3]  }
 0x2a0   :  { %438 = dma.done.wait [#allocation3], 128  }
 0x2a1   :  { %439 = vsyncadd [#allocation3], 4294967168 }
 0x2a2   :  { %317 = vsyncpa [#allocation3], 1 }

</bundles_post_ra>
